<compile_context>
chip_gen: v5e
topology: v5e:2x2
jax: 0.10.0
libtpu: 0.0.40
codegen_flags: <defaults>
</compile_context>

<pallas_src>
import math

import jax
import jax.numpy as jnp
import numpy as np
from jax.experimental import pallas as pl
from jax.experimental.pallas import tpu as pltpu


def prefix_attn_kernel(x_ref, wq_ref, wk_ref, wv_ref, wo_ref, pk_ref, pv_ref,
                       o_ref):
    hg = pl.program_id(1)

    f32 = jnp.float32
    bf16 = jnp.bfloat16

    x = x_ref[0]                       # (S, D) bf16
    s_len = x.shape[0]
    g = wq_ref.shape[0]                # heads in this group
    hd = wq_ref.shape[2]

    # Broadcast current tokens over the head-group batch dim (one-time, hoisted).
    xb = jnp.broadcast_to(x[None], (g, s_len, x.shape[1]))        # (G, S, D) bf16

    # Grouped QKV projections (bf16 in, f32 accumulate), re-narrowed for the
    # following MXU ops.
    q = jnp.einsum('gsd,gdh->gsh', xb, wq_ref[...],
                   preferred_element_type=f32).astype(bf16)        # (G, S, HD)
    k = jnp.einsum('gsd,gdh->gsh', xb, wk_ref[...],
                   preferred_element_type=f32).astype(bf16)
    v = jnp.einsum('gsd,gdh->gsh', xb, wv_ref[...],
                   preferred_element_type=f32).astype(bf16)

    scale = 1.0 / math.sqrt(hd)

    # Split score blocks: prefix keys (always visible) vs. current keys
    # (causal). No concatenate, no transpose — both are dot_generals that
    # contract the head dim.
    s_cur = jnp.einsum('gqh,gkh->gqk', q, k,
                       preferred_element_type=f32) * scale         # (G, S, S)
    s_pre = jnp.einsum('gqh,glh->gql', q, pk_ref[...],
                       preferred_element_type=f32) * scale         # (G, S, L)

    rows = jax.lax.broadcasted_iota(jnp.int32, (s_len, s_len), 0)
    cols = jax.lax.broadcasted_iota(jnp.int32, (s_len, s_len), 1)
    s_cur = jnp.where((cols <= rows)[None], s_cur, -1e30)

    # Shared softmax over the two blocks (f32).
    m = jnp.maximum(jnp.max(s_cur, axis=-1, keepdims=True),
                    jnp.max(s_pre, axis=-1, keepdims=True))        # (G, S, 1)
    e_cur = jnp.exp(s_cur - m)
    e_pre = jnp.exp(s_pre - m)
    denom = (jnp.sum(e_cur, axis=-1, keepdims=True) +
             jnp.sum(e_pre, axis=-1, keepdims=True))
    inv = pl.reciprocal(denom, approx=True)
    p_cur = (e_cur * inv).astype(bf16)
    p_pre = (e_pre * inv).astype(bf16)

    # Value mix (prefix + current) and this group's output-projection
    # contribution, reduced over the heads of the group.
    head_out = (jnp.einsum('gqk,gkh->gqh', p_cur, v,
                           preferred_element_type=f32) +
                jnp.einsum('gql,glh->gqh', p_pre, pv_ref[...],
                           preferred_element_type=f32))            # (G, S, HD)
    contrib = jnp.einsum('gqh,ghd->gqd', head_out.astype(bf16), wo_ref[...],
                         preferred_element_type=f32)               # (G, S, D)
    contrib = jnp.sum(contrib, axis=0)                             # (S, D) f32

    @pl.when(hg == 0)
    def _():
        o_ref[0] = contrib                 # first group: write, no zero+readback

    @pl.when(hg > 0)
    def _():
        o_ref[0] = o_ref[0] + contrib      # later groups: accumulate


def prefix_adapter_v2_forward(x, params, *, heads_per_step=None):
    """x: [B, S, D] float32. Returns attention output [B, S, D] float32."""
    B, S, D = x.shape
    H = params["num_heads"]
    HD = D // H
    L = params["Pk"].shape[2]

    G = H if heads_per_step is None else heads_per_step
    assert H % G == 0
    HG = H // G

    cdt = jnp.bfloat16
    # Glue: per-head weight layouts, cast once to bf16 (halves weight HBM traffic;
    # accumulation inside the kernel stays f32).
    x_bf = x.astype(cdt)
    wq_h = params["Wq"].reshape(D, H, HD).transpose(1, 0, 2).astype(cdt)  # [H, D, HD]
    wk_h = params["Wk"].reshape(D, H, HD).transpose(1, 0, 2).astype(cdt)
    wv_h = params["Wv"].reshape(D, H, HD).transpose(1, 0, 2).astype(cdt)
    wo_h = params["Wo"].reshape(H, HD, D).astype(cdt)                     # [H, HD, D]
    pk_h = params["Pk"].reshape(H, L, HD).astype(cdt)                     # [H, L, HD]
    pv_h = params["Pv"].reshape(H, L, HD).astype(cdt)

    out = pl.pallas_call(
        prefix_attn_kernel,
        out_shape=jax.ShapeDtypeStruct((B, S, D), jnp.float32),
        grid=(B, HG),
        in_specs=[
            pl.BlockSpec((1, S, D), lambda b, hg: (b, 0, 0)),      # x
            pl.BlockSpec((G, D, HD), lambda b, hg: (hg, 0, 0)),    # Wq group
            pl.BlockSpec((G, D, HD), lambda b, hg: (hg, 0, 0)),    # Wk group
            pl.BlockSpec((G, D, HD), lambda b, hg: (hg, 0, 0)),    # Wv group
            pl.BlockSpec((G, HD, D), lambda b, hg: (hg, 0, 0)),    # Wo group
            pl.BlockSpec((G, L, HD), lambda b, hg: (hg, 0, 0)),    # adapter_Pk
            pl.BlockSpec((G, L, HD), lambda b, hg: (hg, 0, 0)),    # adapter_Pv
        ],
        out_specs=pl.BlockSpec((1, S, D), lambda b, hg: (b, 0, 0)),
        compiler_params=pltpu.CompilerParams(
            dimension_semantics=("parallel", "arbitrary")),
    )(x_bf, wq_h, wk_h, wv_h, wo_h, pk_h, pv_h)
    return out


def reference_forward(x, params):
    """Pure-JAX f32 reference for correctness check."""
    B, S, D = x.shape
    H = params["num_heads"]
    HD = D // H
    L = params["Pk"].shape[2]

    def split_heads(t):   # [B, S, D] -> [B, H, S, HD]
        return t.reshape(B, S, H, HD).transpose(0, 2, 1, 3)

    q = split_heads(x @ params["Wq"])
    k = split_heads(x @ params["Wk"])
    v = split_heads(x @ params["Wv"])

    pk = jnp.broadcast_to(params["Pk"], (B, H, L, HD))   # .repeat(b, 1, 1, 1)
    pv = jnp.broadcast_to(params["Pv"], (B, H, L, HD))
    k_full = jnp.concatenate([pk, k], axis=2)
    v_full = jnp.concatenate([pv, v], axis=2)

    scores = jnp.einsum("bhqd,bhkd->bhqk", q, k_full) / math.sqrt(HD)
    rows = jnp.arange(S)[:, None]
    cols = jnp.arange(L + S)[None, :]
    mask = (cols < L) | ((cols - L) <= rows)
    scores = jnp.where(mask[None, None], scores, -1e30)
    probs = jax.nn.softmax(scores, axis=-1)
    out = jnp.einsum("bhqk,bhkd->bhqd", probs, v_full)
    out = out.transpose(0, 2, 1, 3).reshape(B, S, D)
    return out @ params["Wo"]


if __name__ == "__main__":
    # Small, self-consistent shapes.
    B, S, D, H, L = 2, 8, 32, 4, 8
    init_std = 0.001

    key = jax.random.PRNGKey(0)
    kx, kq, kk, kv, ko, kpk, kpv = jax.random.split(key, 7)

    x = jax.random.normal(kx, (B, S, D), dtype=jnp.float32)
    params = {
        "num_heads": H,
        "Wq": 0.02 * jax.random.normal(kq, (D, D), dtype=jnp.float32),
        "Wk": 0.02 * jax.random.normal(kk, (D, D), dtype=jnp.float32),
        "Wv": 0.02 * jax.random.normal(kv, (D, D), dtype=jnp.float32),
        "Wo": 0.02 * jax.random.normal(ko, (D, D), dtype=jnp.float32),
        # adapter_Pk / adapter_Pv: N(0, init_std). (The torch.clamp in the
        # original __init__ is not in-place, so it is a no-op.)
        "Pk": init_std * jax.random.normal(kpk, (1, H, L, D // H),
                                           dtype=jnp.float32),
        "Pv": init_std * jax.random.normal(kpv, (1, H, L, D // H),
                                           dtype=jnp.float32),
    }

    out = prefix_adapter_v2_forward(x, params)
    out = jax.block_until_ready(out)

    ref = reference_forward(x, params)
    # bf16 MXU inputs (f32 accumulation) => slightly looser agreement with the
    # pure-f32 reference than the old all-f32 kernel.
    np.testing.assert_allclose(np.asarray(out), np.asarray(ref),
                               rtol=5e-2, atol=5e-4)

    print("KERNEL_OK")
</pallas_src>

<mosaic_0001>
module attributes {stable_mosaic.version = 11 : i64} {
  func.func @prefix_attn_kernel(%arg0: i32, %arg1: i32, %arg2: memref<1x8x32xbf16, #tpu.memory_space<vmem>>, %arg3: memref<4x32x8xbf16, #tpu.memory_space<vmem>>, %arg4: memref<4x32x8xbf16, #tpu.memory_space<vmem>>, %arg5: memref<4x32x8xbf16, #tpu.memory_space<vmem>>, %arg6: memref<4x8x32xbf16, #tpu.memory_space<vmem>>, %arg7: memref<4x8x8xbf16, #tpu.memory_space<vmem>>, %arg8: memref<4x8x8xbf16, #tpu.memory_space<vmem>>, %arg9: memref<1x8x32xf32, #tpu.memory_space<vmem>>) attributes {dimension_semantics = [#tpu.dimension_semantics<parallel>, #tpu.dimension_semantics<arbitrary>], iteration_bounds = array<i64: 2, 1>, scalar_prefetch = 0 : i64, scratch_operands = 0 : i64, tpu.core_type = #tpu.core_type<tc>, window_params = [{transform_indices = @transform_0, window_bounds = array<i64: 1, 8, 32>}, {transform_indices = @transform_1, window_bounds = array<i64: 4, 32, 8>}, {transform_indices = @transform_2, window_bounds = array<i64: 4, 32, 8>}, {transform_indices = @transform_3, window_bounds = array<i64: 4, 32, 8>}, {transform_indices = @transform_4, window_bounds = array<i64: 4, 8, 32>}, {transform_indices = @transform_5, window_bounds = array<i64: 4, 8, 8>}, {transform_indices = @transform_6, window_bounds = array<i64: 4, 8, 8>}, {transform_indices = @transform_7, window_bounds = array<i64: 1, 8, 32>}]} {
    %c0 = arith.constant 0 : index
    %c0_0 = arith.constant 0 : index
    %c0_1 = arith.constant 0 : index
    %0 = vector.load %arg2[%c0, %c0_0, %c0_1] : memref<1x8x32xbf16, #tpu.memory_space<vmem>>, vector<1x8x32xbf16>
    %1 = vector.shape_cast %0 : vector<1x8x32xbf16> to vector<8x32xbf16>
    %2 = vector.shape_cast %1 : vector<8x32xbf16> to vector<1x8x32xbf16>
    %3 = vector.shape_cast %2 : vector<1x8x32xbf16> to vector<1x8x32xbf16>
    %4 = vector.broadcast %3 : vector<1x8x32xbf16> to vector<4x8x32xbf16>
    %c0_2 = arith.constant 0 : index
    %c0_3 = arith.constant 0 : index
    %c0_4 = arith.constant 0 : index
    %5 = vector.load %arg3[%c0_2, %c0_3, %c0_4] : memref<4x32x8xbf16, #tpu.memory_space<vmem>>, vector<4x32x8xbf16>
    "tpu.trace_start"() <{level = 10 : i32, message = "gsd,gdh->gsh"}> : () -> ()
    %cst = arith.constant dense<0.000000e+00> : vector<4x8x8xf32>
    %6 = tpu.matmul %4, %5, %cst {dimension_numbers = #tpu.dot_dimension_numbers<[2], [1], [1], [2], [0, 0, 0, 1, 1, 2], [0], [0]>} : vector<4x8x32xbf16>, vector<4x32x8xbf16>, vector<4x8x8xf32> -> vector<4x8x8xf32>
    "tpu.trace_stop"() : () -> ()
    %7 = arith.truncf %6 : vector<4x8x8xf32> to vector<4x8x8xbf16>
    %c0_5 = arith.constant 0 : index
    %c0_6 = arith.constant 0 : index
    %c0_7 = arith.constant 0 : index
    %8 = vector.load %arg4[%c0_5, %c0_6, %c0_7] : memref<4x32x8xbf16, #tpu.memory_space<vmem>>, vector<4x32x8xbf16>
    "tpu.trace_start"() <{level = 10 : i32, message = "gsd,gdh->gsh"}> : () -> ()
    %cst_8 = arith.constant dense<0.000000e+00> : vector<4x8x8xf32>
    %9 = tpu.matmul %4, %8, %cst_8 {dimension_numbers = #tpu.dot_dimension_numbers<[2], [1], [1], [2], [0, 0, 0, 1, 1, 2], [0], [0]>} : vector<4x8x32xbf16>, vector<4x32x8xbf16>, vector<4x8x8xf32> -> vector<4x8x8xf32>
    "tpu.trace_stop"() : () -> ()
    %10 = arith.truncf %9 : vector<4x8x8xf32> to vector<4x8x8xbf16>
    %c0_9 = arith.constant 0 : index
    %c0_10 = arith.constant 0 : index
    %c0_11 = arith.constant 0 : index
    %11 = vector.load %arg5[%c0_9, %c0_10, %c0_11] : memref<4x32x8xbf16, #tpu.memory_space<vmem>>, vector<4x32x8xbf16>
    "tpu.trace_start"() <{level = 10 : i32, message = "gsd,gdh->gsh"}> : () -> ()
    %cst_12 = arith.constant dense<0.000000e+00> : vector<4x8x8xf32>
    %12 = tpu.matmul %4, %11, %cst_12 {dimension_numbers = #tpu.dot_dimension_numbers<[2], [1], [1], [2], [0, 0, 0, 1, 1, 2], [0], [0]>} : vector<4x8x32xbf16>, vector<4x32x8xbf16>, vector<4x8x8xf32> -> vector<4x8x8xf32>
    "tpu.trace_stop"() : () -> ()
    %13 = arith.truncf %12 : vector<4x8x8xf32> to vector<4x8x8xbf16>
    "tpu.trace_start"() <{level = 10 : i32, message = "gqh,gkh->gqk"}> : () -> ()
    %cst_13 = arith.constant dense<0.000000e+00> : vector<4x8x8xf32>
    %14 = tpu.matmul %7, %10, %cst_13 {dimension_numbers = #tpu.dot_dimension_numbers<[2], [2], [1], [1], [0, 0, 0, 1, 1, 1], [0], [0]>} : vector<4x8x8xbf16>, vector<4x8x8xbf16>, vector<4x8x8xf32> -> vector<4x8x8xf32>
    "tpu.trace_stop"() : () -> ()
    %cst_14 = arith.constant 0.353553385 : f32
    %15 = vector.broadcast %cst_14 : f32 to vector<4x8x8xf32>
    %16 = arith.mulf %14, %15 : vector<4x8x8xf32>
    %c0_15 = arith.constant 0 : index
    %c0_16 = arith.constant 0 : index
    %c0_17 = arith.constant 0 : index
    %17 = vector.load %arg7[%c0_15, %c0_16, %c0_17] : memref<4x8x8xbf16, #tpu.memory_space<vmem>>, vector<4x8x8xbf16>
    "tpu.trace_start"() <{level = 10 : i32, message = "gqh,glh->gql"}> : () -> ()
    %cst_18 = arith.constant dense<0.000000e+00> : vector<4x8x8xf32>
    %18 = tpu.matmul %7, %17, %cst_18 {dimension_numbers = #tpu.dot_dimension_numbers<[2], [2], [1], [1], [0, 0, 0, 1, 1, 1], [0], [0]>} : vector<4x8x8xbf16>, vector<4x8x8xbf16>, vector<4x8x8xf32> -> vector<4x8x8xf32>
    "tpu.trace_stop"() : () -> ()
    %cst_19 = arith.constant 0.353553385 : f32
    %19 = vector.broadcast %cst_19 : f32 to vector<4x8x8xf32>
    %20 = arith.mulf %18, %19 : vector<4x8x8xf32>
    %21 = tpu.iota {dimensions = array<i32: 0>} : vector<8x8xi32>
    %22 = tpu.iota {dimensions = array<i32: 1>} : vector<8x8xi32>
    %23 = arith.cmpi sle, %22, %21 : vector<8x8xi32>
    %24 = vector.shape_cast %23 : vector<8x8xi1> to vector<1x8x8xi1>
    %cst_20 = arith.constant -1.000000e+30 : f32
    %25 = vector.shape_cast %24 : vector<1x8x8xi1> to vector<1x8x8xi1>
    %26 = vector.broadcast %25 : vector<1x8x8xi1> to vector<4x8x8xi1>
    %27 = vector.broadcast %cst_20 : f32 to vector<4x8x8xf32>
    %28 = arith.select %26, %16, %27 : vector<4x8x8xi1>, vector<4x8x8xf32>
    %cst_21 = arith.constant dense<0xFF800000> : vector<4x8xf32>
    %29 = vector.multi_reduction <maximumf>, %28, %cst_21 [2] : vector<4x8x8xf32> to vector<4x8xf32>
    %30 = vector.shape_cast %29 : vector<4x8xf32> to vector<4x8x1xf32>
    %cst_22 = arith.constant dense<0xFF800000> : vector<4x8xf32>
    %31 = vector.multi_reduction <maximumf>, %20, %cst_22 [2] : vector<4x8x8xf32> to vector<4x8xf32>
    %32 = vector.shape_cast %31 : vector<4x8xf32> to vector<4x8x1xf32>
    %33 = arith.maximumf %30, %32 : vector<4x8x1xf32>
    %34 = vector.broadcast %33 : vector<4x8x1xf32> to vector<4x8x8xf32>
    %35 = arith.subf %28, %34 : vector<4x8x8xf32>
    %36 = math.exp %35 : vector<4x8x8xf32>
    %37 = vector.broadcast %33 : vector<4x8x1xf32> to vector<4x8x8xf32>
    %38 = arith.subf %20, %37 : vector<4x8x8xf32>
    %39 = math.exp %38 : vector<4x8x8xf32>
    %cst_23 = arith.constant dense<0.000000e+00> : vector<4x8xf32>
    %40 = vector.multi_reduction <add>, %36, %cst_23 [2] : vector<4x8x8xf32> to vector<4x8xf32>
    %41 = vector.shape_cast %40 : vector<4x8xf32> to vector<4x8x1xf32>
    %cst_24 = arith.constant dense<0.000000e+00> : vector<4x8xf32>
    %42 = vector.multi_reduction <add>, %39, %cst_24 [2] : vector<4x8x8xf32> to vector<4x8xf32>
    %43 = vector.shape_cast %42 : vector<4x8xf32> to vector<4x8x1xf32>
    %44 = arith.addf %41, %43 : vector<4x8x1xf32>
    %45 = tpu.reciprocal %44 {approx = true} : vector<4x8x1xf32> -> vector<4x8x1xf32>
    %46 = vector.broadcast %45 : vector<4x8x1xf32> to vector<4x8x8xf32>
    %47 = arith.mulf %36, %46 : vector<4x8x8xf32>
    %48 = arith.truncf %47 : vector<4x8x8xf32> to vector<4x8x8xbf16>
    %49 = vector.broadcast %45 : vector<4x8x1xf32> to vector<4x8x8xf32>
    %50 = arith.mulf %39, %49 : vector<4x8x8xf32>
    %51 = arith.truncf %50 : vector<4x8x8xf32> to vector<4x8x8xbf16>
    "tpu.trace_start"() <{level = 10 : i32, message = "gqk,gkh->gqh"}> : () -> ()
    %cst_25 = arith.constant dense<0.000000e+00> : vector<4x8x8xf32>
    %52 = tpu.matmul %48, %13, %cst_25 {dimension_numbers = #tpu.dot_dimension_numbers<[2], [1], [1], [2], [0, 0, 0, 1, 1, 2], [0], [0]>} : vector<4x8x8xbf16>, vector<4x8x8xbf16>, vector<4x8x8xf32> -> vector<4x8x8xf32>
    "tpu.trace_stop"() : () -> ()
    %c0_26 = arith.constant 0 : index
    %c0_27 = arith.constant 0 : index
    %c0_28 = arith.constant 0 : index
    %53 = vector.load %arg8[%c0_26, %c0_27, %c0_28] : memref<4x8x8xbf16, #tpu.memory_space<vmem>>, vector<4x8x8xbf16>
    "tpu.trace_start"() <{level = 10 : i32, message = "gql,glh->gqh"}> : () -> ()
    %cst_29 = arith.constant dense<0.000000e+00> : vector<4x8x8xf32>
    %54 = tpu.matmul %51, %53, %cst_29 {dimension_numbers = #tpu.dot_dimension_numbers<[2], [1], [1], [2], [0, 0, 0, 1, 1, 2], [0], [0]>} : vector<4x8x8xbf16>, vector<4x8x8xbf16>, vector<4x8x8xf32> -> vector<4x8x8xf32>
    "tpu.trace_stop"() : () -> ()
    %55 = arith.addf %52, %54 : vector<4x8x8xf32>
    %56 = arith.truncf %55 : vector<4x8x8xf32> to vector<4x8x8xbf16>
    %c0_30 = arith.constant 0 : index
    %c0_31 = arith.constant 0 : index
    %c0_32 = arith.constant 0 : index
    %57 = vector.load %arg6[%c0_30, %c0_31, %c0_32] : memref<4x8x32xbf16, #tpu.memory_space<vmem>>, vector<4x8x32xbf16>
    "tpu.trace_start"() <{level = 10 : i32, message = "gqh,ghd->gqd"}> : () -> ()
    %cst_33 = arith.constant dense<0.000000e+00> : vector<4x8x32xf32>
    %58 = tpu.matmul %56, %57, %cst_33 {dimension_numbers = #tpu.dot_dimension_numbers<[2], [1], [1], [2], [0, 0, 0, 1, 1, 2], [0], [0]>} : vector<4x8x8xbf16>, vector<4x8x32xbf16>, vector<4x8x32xf32> -> vector<4x8x32xf32>
    "tpu.trace_stop"() : () -> ()
    %cst_34 = arith.constant dense<0.000000e+00> : vector<8x32xf32>
    %59 = vector.multi_reduction <add>, %58, %cst_34 [0] : vector<4x8x32xf32> to vector<8x32xf32>
    %c0_i32 = arith.constant 0 : i32
    %60 = arith.cmpi eq, %arg1, %c0_i32 : i32
    %61 = arith.extui %60 : i1 to i32
    %c0_i32_35 = arith.constant 0 : i32
    %62 = arith.cmpi ne, %61, %c0_i32_35 : i32
    scf.if %62 {
      %c0_38 = arith.constant 0 : index
      %c0_39 = arith.constant 0 : index
      %c0_40 = arith.constant 0 : index
      %66 = vector.load %arg9[%c0_38, %c0_39, %c0_40] : memref<1x8x32xf32, #tpu.memory_space<vmem>>, vector<1x8x32xf32>
      %67 = vector.shape_cast %66 : vector<1x8x32xf32> to vector<8x32xf32>
      %68 = vector.shape_cast %59 : vector<8x32xf32> to vector<1x8x32xf32>
      tpu.vector_store %arg9[%c0_38, %c0_39, %c0_40], %68 {strides = array<i32>} : memref<1x8x32xf32, #tpu.memory_space<vmem>>, vector<1x8x32xf32>,
    } else {
    }
    %c0_i32_36 = arith.constant 0 : i32
    %63 = arith.cmpi sgt, %arg1, %c0_i32_36 : i32
    %64 = arith.extui %63 : i1 to i32
    %c0_i32_37 = arith.constant 0 : i32
    %65 = arith.cmpi ne, %64, %c0_i32_37 : i32
    scf.if %65 {
      %c0_38 = arith.constant 0 : index
      %c0_39 = arith.constant 0 : index
      %c0_40 = arith.constant 0 : index
      %66 = vector.load %arg9[%c0_38, %c0_39, %c0_40] : memref<1x8x32xf32, #tpu.memory_space<vmem>>, vector<1x8x32xf32>
      %67 = vector.shape_cast %66 : vector<1x8x32xf32> to vector<8x32xf32>
      %68 = arith.addf %67, %59 : vector<8x32xf32>
      %c0_41 = arith.constant 0 : index
      %c0_42 = arith.constant 0 : index
      %c0_43 = arith.constant 0 : index
      %69 = vector.load %arg9[%c0_41, %c0_42, %c0_43] : memref<1x8x32xf32, #tpu.memory_space<vmem>>, vector<1x8x32xf32>
      %70 = vector.shape_cast %69 : vector<1x8x32xf32> to vector<8x32xf32>
      %71 = vector.shape_cast %68 : vector<8x32xf32> to vector<1x8x32xf32>
      tpu.vector_store %arg9[%c0_41, %c0_42, %c0_43], %71 {strides = array<i32>} : memref<1x8x32xf32, #tpu.memory_space<vmem>>, vector<1x8x32xf32>,
    } else {
    }
    return
  }
  func.func @transform_0(%arg0: i32, %arg1: i32) -> (i32, i32, i32) {
    %c0_i32 = arith.constant 0 : i32
    %c0_i32_0 = arith.constant 0 : i32
    %c0_i32_1 = arith.constant 0 : i32
    return %arg0, %c0_i32, %c0_i32_0 : i32, i32, i32
  }
  func.func @transform_1(%arg0: i32, %arg1: i32) -> (i32, i32, i32) {
    %c0_i32 = arith.constant 0 : i32
    %c0_i32_0 = arith.constant 0 : i32
    %c0_i32_1 = arith.constant 0 : i32
    return %arg1, %c0_i32, %c0_i32_0 : i32, i32, i32
  }
  func.func @transform_2(%arg0: i32, %arg1: i32) -> (i32, i32, i32) {
    %c0_i32 = arith.constant 0 : i32
    %c0_i32_0 = arith.constant 0 : i32
    %c0_i32_1 = arith.constant 0 : i32
    return %arg1, %c0_i32, %c0_i32_0 : i32, i32, i32
  }
  func.func @transform_3(%arg0: i32, %arg1: i32) -> (i32, i32, i32) {
    %c0_i32 = arith.constant 0 : i32
    %c0_i32_0 = arith.constant 0 : i32
    %c0_i32_1 = arith.constant 0 : i32
    return %arg1, %c0_i32, %c0_i32_0 : i32, i32, i32
  }
  func.func @transform_4(%arg0: i32, %arg1: i32) -> (i32, i32, i32) {
    %c0_i32 = arith.constant 0 : i32
    %c0_i32_0 = arith.constant 0 : i32
    %c0_i32_1 = arith.constant 0 : i32
    return %arg1, %c0_i32, %c0_i32_0 : i32, i32, i32
  }
  func.func @transform_5(%arg0: i32, %arg1: i32) -> (i32, i32, i32) {
    %c0_i32 = arith.constant 0 : i32
    %c0_i32_0 = arith.constant 0 : i32
    %c0_i32_1 = arith.constant 0 : i32
    return %arg1, %c0_i32, %c0_i32_0 : i32, i32, i32
  }
  func.func @transform_6(%arg0: i32, %arg1: i32) -> (i32, i32, i32) {
    %c0_i32 = arith.constant 0 : i32
    %c0_i32_0 = arith.constant 0 : i32
    %c0_i32_1 = arith.constant 0 : i32
    return %arg1, %c0_i32, %c0_i32_0 : i32, i32, i32
  }
  func.func @transform_7(%arg0: i32, %arg1: i32) -> (i32, i32, i32) {
    %c0_i32 = arith.constant 0 : i32
    %c0_i32_0 = arith.constant 0 : i32
    %c0_i32_1 = arith.constant 0 : i32
    return %arg0, %c0_i32, %c0_i32_0 : i32, i32, i32
  }
}

</mosaic_0001>

<bundles_post_ra>
// kernel: tpu_custom_call.1
= control target key start
LH: loop header
LB: loop body
LE: loop exit
PB: predicated region body
PF: predicated region fallthrough
CT: control target
= control target key end

     0   :  { %12 = vsyncpa [#allocation3], 0  ;;  %s2152_s0 = inlined_call_operand.vmem [shape: bf16[2,8,32], index: 0, kind: input, shape index: {}]   ;;  %s2153_s1 = inlined_call_operand.vmem [shape: bf16[4,32,8], index: 1, kind: input, shape index: {}]   ;;  %s2154_s2 = inlined_call_operand.vmem [shape: bf16[4,32,8], index: 2, kind: input, shape index: {}]   ;;  %s2155_s3 = inlined_call_operand.vmem [shape: bf16[4,32,8], index: 3, kind: input, shape index: {}]   ;;  %s2156_s4 = inlined_call_operand.vmem [shape: bf16[4,8,32], index: 4, kind: input, shape index: {}]   ;;  %s2157_s5 = inlined_call_operand.vmem [shape: bf16[4,8,8], index: 5, kind: input, shape index: {}]   ;;  %s2158_s6 = inlined_call_operand.vmem [shape: bf16[4,8,8], index: 6, kind: input, shape index: {}]   ;;  %s2159_s7 = inlined_call_operand.hbm [shape: f32[2,8,32], index: 7, kind: output, shape index: {}]  }
   0x1   :  { %14 = vsyncpa [#allocation3 + $0x1], 0  ;;  %s1858_s24 = smov 0   ;;  %s1860_s25 = smov 0  }
   0x2   :  { %s1862_s26 = smov 0   ;;  %s1864_s27 = smov 0  }
   0x3   :  { %s1866_s28 = smov 0   ;;  %s1868_s29 = smov 0  }
   0x4 LB: > { %s1490_s30 = sadd.s32 4294967295, %s1816_s29   ;;  %s1491_s8 = sadd.s32 4294967294, %s1816_s29   ;;  %s1816_s29 = sphi %s1868_s29, %s20_s29   ;;  %s1812_s28 = sphi %s1866_s28, %s2166_s28   ;;  %s1808_s27 = sphi %s1864_s27, %s2165_s27   ;;  %s1804_s26 = sphi %s1862_s26, %s2164_s26   ;;  %s1800_s25 = sphi %s1860_s25, %s2163_s25   ;;  %s1796_s24 = sphi %s1858_s24, %s2162_s24  }
   0x5   : > { %s32_s9 = sadd.s32 1, %s1812_s28  ;;  %s221_s10 = sadd.s32 1, %s1804_s26 }
   0x6   : > { %p34_p0 = scmp.ge.s32.totalorder %s32_s9, 2  ;;  %p231_p1 = scmp.ne.s32.totalorder %s1804_s26, %s1800_s25 }
   0x7   : > { %p232_p2 = scmp.eq.s32.totalorder %s1490_s30, 1  ;;  %p237_p3 = scmp.ne.s32.totalorder %s1800_s25, %s1796_s24 }
   0x8   : > { %s2168_s9 = smov (%p34_p0, %s32_s9), 0  ;;  %p238_p5 = scmp.eq.s32.totalorder %s1491_s8, 1 }
   0x9   : > { %p1898_p4 = por %p232_p2, %p231_p1  ;;  %s218_s12 = ssub.s32 %s1812_s28, %s2168_s9 }
   0xa   : > { %p1500_p6 = scmp.ge.s32.totalorder %s1816_s29, 1  ;;  %p219_p7 = scmp.eq.s32.totalorder %s218_s12, 0 }
   0xb   : > { %p1905_p8 = por %p238_p5, %p237_p3  ;;  %p320_p9 = scmp.lt.s32.totalorder %s1816_s29, 3 }
   0xc   : > { %s1911_s14 = scalar_select %p219_p7, %s1804_s26, %s221_s10  }
   0xd   : > { %p321_p10 = pnand %p1500_p6, %p320_p9 }
   0xe   : > { %p384_p11 = scmp.lt.s32.totalorder (!%p321_p10), %s1808_s27, 1  ;;  %s381_s15 = sand.u32 (!%p321_p10), 1, %s1800_s25  }
   0xf   : > { %324 = sbr.rel (%p321_p10) target bundleno = 904 (0x388), region = 48  ;;  %s1632_s16 = sshll.u32 (!%p321_p10), %s1808_s27, 3 }
  0x10   : > { %s1328_s20 = scalar_lea.hbm (!%p321_p10), %s2159_s7, %s1632_s16 }
  0x11   : > { %s1332_s22 = sshll.u32 (!%p321_p10), %s1328_s20, 4  ;;  %s1333_s22 = int_to_ptr.hbm [resolvable:$true] %s1332_s22 }
  0x12   : > { %s1752_s23 = sshra.s32 (!%p321_p10), %s1333_s22, 4  ;;  %s1753_s23 = int_to_ptr.hbm [resolvable:$true] %s1752_s23 }
  0x13   : > { %s1754_s30 = scalar_lea.hbm (!%p321_p10), %s1753_s23, 8  ;;  %p1759_p1 = scmp.lt.s32.totalorder (!%p321_p10), %s1753_s23, %s2159_s7 }
  0x14   : > { %v1636_v0 = vld [vmem:[%s2153_s1 + $0x8] sm:$0xff]  ;;  %v1638_v1 = vld [vmem:[%s2153_s1 + $0x18] sm:$0xff]  ;;  %v1635_v4 = vld [vmem:[%s2153_s1] sm:$0xff]  ;;  %s385_s12 = scalar_select %p384_p11, %s1808_s27, 1  ;;  %vm457_vm0 = vcmask 261120   ;;  %vm793_vm1 = vcmask 64512  }
  0x15   : > { %v1640_v2 = vld [vmem:[%s2153_s1 + $0x28] sm:$0xff]  ;;  %v1642_v3 = vld [vmem:[%s2153_s1 + $0x38] sm:$0xff]  ;;  %467 = vmatpush.bf16.msra.mxu0 %v1636_v0  ;;  %492 = vmatpush.bf16.msra.mxu1 %v1638_v1  ;;  %v1637_v5 = vld [vmem:[%s2153_s1 + $0x10] sm:$0xff]  ;;  %vm1064_vm2 = vcmask 1043456   ;;  %s1318_s27 = scalar_lea.sflag [#allocation3], %s381_s15  ;;  %p1755_p12 = scmp.ne.s32.totalorder %s1753_s23, %s1754_s30 }
  0x16   : > { %517 = vmatpush.bf16.msra.mxu2 %v1640_v2  ;;  %542 = vmatpush.bf16.msra.mxu3 %v1642_v3  ;;  %v1639_v6 = vld [vmem:[%s2153_s1 + $0x20] sm:$0xff]  ;;  %v1641_v7 = vld [vmem:[%s2153_s1 + $0x30] sm:$0xff]  ;;  %s1502_s19 = sshll.u32 %s385_s12, 2  ;;  %v1644_v8 = vld [vmem:[%s2154_s2 + $0x8] sm:$0xff]  ;;  %s1501_s12 = sshll.u32 %s381_s15, 3 }
  0x17   : > { %v1646_v9 = vld [vmem:[%s2154_s2 + $0x18] sm:$0xff]  ;;  %s387_s10 = scalar_lea.vmem %s2152_s0, %s1502_s19  ;;  %v1648_v11 = vld [vmem:[%s2154_s2 + $0x28] sm:$0xff]  ;;  %v1643_v13 = vld [vmem:[%s2154_s2] sm:$0xff]  ;;  %s383_s19 = scalar_lea.vmem [#allocation2], %s1501_s12 }
  0x18   : > { %v428_v10 = vld [vmem:[%s387_s10] sm:$0xf]  ;;  %v1650_v12 = vld [vmem:[%s2154_s2 + $0x38] sm:$0xff]  ;;  %v1645_v14 = vld [vmem:[%s2154_s2 + $0x10] sm:$0xff]  ;;  %s1330_s21 = sshll.u32 %s383_s19, 4  ;;  %p1756_p13 = pnand %p1755_p12, %p1898_p4  ;;  %s1331_s21 = int_to_ptr.vmem [resolvable:$true] %s1330_s21 }
  0x19   : > { %468 = vmatpush.bf16.msra.mxu0 %v1635_v4  ;;  %493 = vmatpush.bf16.msra.mxu1 %v1637_v5  ;;  %v1647_v15 = vld [vmem:[%s2154_s2 + $0x20] sm:$0xff]  ;;  %v1649_v16 = vld [vmem:[%s2154_s2 + $0x30] sm:$0xff]  ;;  %v1652_v17 = vld [vmem:[%s2155_s3 + $0x8] sm:$0xff]  ;;  %s1758_s12 = scalar_lea.hbm %s2159_s7, 16 }
  0x1a   : > { %518 = vmatpush.bf16.msra.mxu2 %v1639_v6  ;;  %543 = vmatpush.bf16.msra.mxu3 %v1641_v7  ;;  %v1654_v18 = vld [vmem:[%s2155_s3 + $0x18] sm:$0xff]  ;;  %v1656_v19 = vld [vmem:[%s2155_s3 + $0x28] sm:$0xff]  ;;  %v1655_v20 = vld [vmem:[%s2155_s3 + $0x20] sm:$0xff]  ;;  %p1757_p0 = pneg %p1756_p13  ;;  %p1760_p2 = scmp.lt.s32.totalorder %s1758_s12, %s1754_s30 }
  0x1b   : > { %v1651_v21 = vld [vmem:[%s2155_s3] sm:$0xff]  ;;  %v1653_v22 = vld [vmem:[%s2155_s3 + $0x10] sm:$0xff]  ;;  %v1658_v23 = vld [vmem:[%s2155_s3 + $0x38] sm:$0xff] }
  0x1c   : > { %1511 = vmatmul.msk.bf16.vlgmr.msra.gmra.mxu0 %vm457_vm0, %v428_v10  ;;  %1520 = vmatmul.msk.bf16.vlgmr.msra.gmra.mxu1 %vm457_vm0, %v428_v10  ;;  %v1657_v24 = vld [vmem:[%s2155_s3 + $0x30] sm:$0xff]  ;;  %v874_v33 = vld [vmem:[%s2157_s5] sm:$0xf]  ;;  %v875_v34 = vld [vmem:[%s2157_s5 + $0x4] sm:$0xf]  ;;  %p1761_p3 = por %p1760_p2, %p1759_p1 }
  0x1d   : > { %587 = vmatpush.bf16.msrb.mxu0 %v1644_v8  ;;  %612 = vmatpush.bf16.msrb.mxu1 %v1646_v9  ;;  %v879_v39 = vsel %vm793_vm1, %v874_v33, 0  ;;  %v895_v40 = vsel %vm793_vm1, %v875_v34, 0  ;;  %v876_v45 = vld [vmem:[%s2157_s5 + $0x8] sm:$0xf]  ;;  %v877_v46 = vld [vmem:[%s2157_s5 + $0xc] sm:$0xf] }
  0x1e   : > { %1529 = vmatmul.msk.bf16.vlgmr.msra.gmra.mxu2 %vm457_vm0, %v428_v10  ;;  %1538 = vmatmul.msk.bf16.vlgmr.msra.gmra.mxu3 %vm457_vm0, %v428_v10  ;;  %v911_v55 = vsel %vm793_vm1, %v876_v45, 0  ;;  %v927_v56 = vsel %vm793_vm1, %v877_v46, 0  ;;  %v1059_v6 = vld [vmem:[%s2158_s6 + $0x8] sm:$0xf]  ;;  %p1762_p5 = pnand %p1761_p3, %p1757_p0 }
  0x1f   : > { %637 = vmatpush.bf16.msrb.mxu2 %v1648_v11  ;;  %662 = vmatpush.bf16.msrb.mxu3 %v1650_v12  ;;  %v1104_v7 = vsel %vm1064_vm2, %v1059_v6, 0  ;;  %v1060_v11 = vld [vmem:[%s2158_s6 + $0xc] sm:$0xf] }
  0x20   : > { %v1123_v12 = vsel %vm1064_vm2, %v1060_v11, 0 }
  0x21   : > { %588 = vmatpush.bf16.msrb.mxu0 %v1643_v13  ;;  %613 = vmatpush.bf16.msrb.mxu1 %v1645_v14 }
  0x23   : > { %638 = vmatpush.bf16.msrb.mxu2 %v1647_v15  ;;  %663 = vmatpush.bf16.msrb.mxu3 %v1649_v16  ;;  %v1057_v15 = vld [vmem:[%s2158_s6] sm:$0xf] }
  0x24   : > { %v1066_v16 = vsel %vm1064_vm2, %v1057_v15, 0 }
  0x25   : > { %707 = vmatpush.bf16.msra.mxu0 %v1652_v17  ;;  %732 = vmatpush.bf16.msra.mxu1 %v1654_v18 }
  0x27   : > { %757 = vmatpush.bf16.msra.mxu2 %v1656_v19  ;;  %782 = vmatpush.bf16.msra.mxu3 %v1658_v23  ;;  %v1058_v19 = vld [vmem:[%s2158_s6 + $0x4] sm:$0xf] }
  0x29   : > { %708 = vmatpush.bf16.msra.mxu0 %v1651_v21  ;;  %733 = vmatpush.bf16.msra.mxu1 %v1653_v22  ;;  %v946_v21 = vlaneseq }
  0x2b   : > { %758 = vmatpush.bf16.msra.mxu2 %v1655_v20  ;;  %783 = vmatpush.bf16.msra.mxu3 %v1657_v24  ;;  %v1085_v20 = vsel %vm1064_vm2, %v1058_v19, 0  ;;  %v947_v22 = vshrl.u32 %v946_v21, 7  ;;  %v949_v23 = vand.u32 127, %v946_v21 }
  0x2c   : > { %1547 = vmatmul.msk.bf16.vlgmr.msrb.gmra.mxu0 %vm457_vm0, %v428_v10  ;;  %1556 = vmatmul.msk.bf16.vlgmr.msrb.gmra.mxu1 %vm457_vm0, %v428_v10 }
  0x2d   : > { %vm950_vm3 = vcmp.le.s32.totalorder %v949_v23, %v947_v22 }
  0x2e   : > { %1565 = vmatmul.msk.bf16.vlgmr.msrb.gmra.mxu2 %vm457_vm0, %v428_v10  ;;  %1574 = vmatmul.msk.bf16.vlgmr.msrb.gmra.mxu3 %vm457_vm0, %v428_v10 }
  0x3c   : > { %1583 = vmatmul.msk.bf16.vlgmr.msra.gmra.mxu0 %vm457_vm0, %v428_v10  ;;  %1592 = vmatmul.msk.bf16.vlgmr.msra.gmra.mxu1 %vm457_vm0, %v428_v10 }
  0x3e   : > { %1601 = vmatmul.msk.bf16.vlgmr.msra.gmra.mxu2 %vm457_vm0, %v428_v10  ;;  %1610 = vmatmul.msk.bf16.vlgmr.msra.gmra.mxu3 %vm457_vm0, %v428_v10 }
  0x99   : > { %v470_v25 = vpop.f32.mrf.mxu0  ;;  %v495_v26 = vpop.f32.mrf.mxu1 }
  0x9a   : > { %v549_v47 = vpack.c.bf16 %v470_v25, %v470_v25  ;;  %v550_v48 = vpack.c.bf16 %v495_v26, %v495_v26 }
  0xa1   : > { %v520_v27 = vpop.f32.mrf.mxu2  ;;  %v545_v28 = vpop.f32.mrf.mxu3 }
  0xa2   : > { %v472_v29 = vpop.f32.mrf.mxu0  ;;  %v497_v30 = vpop.f32.mrf.mxu1  ;;  %v551_v59 = vpack.c.bf16 %v520_v27, %v520_v27  ;;  %v552_v60 = vpack.c.bf16 %v545_v28, %v545_v28 }
  0xa9   : > { %v522_v31 = vpop.f32.mrf.mxu2  ;;  %v547_v32 = vpop.f32.mrf.mxu3 }
  0xaa   : > { %v590_v35 = vpop.f32.mrf.mxu0  ;;  %v615_v36 = vpop.f32.mrf.mxu1 }
  0xab   : > { %v669_v37 = vpack.c.bf16 %v590_v35, %v590_v35  ;;  %v670_v38 = vpack.c.bf16 %v615_v36, %v615_v36 }
  0xad   : > { %v798_v41 = vsel %vm793_vm1, %v669_v37, 0  ;;  %v817_v42 = vsel %vm793_vm1, %v670_v38, 0 }
  0xae   : > { %807 = vmatpush.bf16.xpose.msrb.mxu0 %v798_v41  ;;  %826 = vmatpush.bf16.xpose.msrb.mxu1 %v817_v42 }
  0xb1   : > { %v640_v43 = vpop.f32.mrf.mxu2  ;;  %v665_v44 = vpop.f32.mrf.mxu3 }
  0xb2   : > { %v671_v49 = vpack.c.bf16 %v640_v43, %v640_v43  ;;  %v672_v50 = vpack.c.bf16 %v665_v44, %v665_v44  ;;  %v592_v51 = vpop.f32.mrf.mxu0  ;;  %v617_v52 = vpop.f32.mrf.mxu1 }
  0xb4   : > { %v836_v53 = vsel %vm793_vm1, %v671_v49, 0  ;;  %v855_v54 = vsel %vm793_vm1, %v672_v50, 0 }
  0xb5   : > { %845 = vmatpush.bf16.xpose.msrb.mxu2 %v836_v53  ;;  %864 = vmatpush.bf16.xpose.msrb.mxu3 %v855_v54 }
  0xb6   : > { %888 = vmatpush.bf16.xpose.msra.mxu0 %v879_v39  ;;  %904 = vmatpush.bf16.xpose.msra.mxu1 %v895_v40 }
  0xb7   : > { %1611 = vmatmul.msk.bf16.vlgmr.msrb.gmra.mxu0 %vm793_vm1, %v549_v47  ;;  %1612 = vmatmul.msk.bf16.vlgmr.msrb.gmra.mxu1 %vm793_vm1, %v550_v48 }
  0xb9   : > { %v642_v57 = vpop.f32.mrf.mxu2  ;;  %v667_v58 = vpop.f32.mrf.mxu3 }
  0xba   : > { %v710_v61 = vpop.f32.mrf.mxu0  ;;  %v735_v62 = vpop.f32.mrf.mxu1 }
  0xbb   : > { %v789_v13 = vpack.c.bf16 %v710_v61, %v710_v61  ;;  %v790_v17 = vpack.c.bf16 %v735_v62, %v735_v62 }
  0xbc   : > { %1613 = vmatmul.msk.bf16.vlgmr.msrb.gmra.mxu2 %vm793_vm1, %v551_v59  ;;  %1614 = vmatmul.msk.bf16.vlgmr.msrb.gmra.mxu3 %vm793_vm1, %v552_v60 }
  0xbd   : > { %920 = vmatpush.bf16.xpose.msra.mxu2 %v911_v55  ;;  %936 = vmatpush.bf16.xpose.msra.mxu3 %v927_v56  ;;  %v1142_v14 = vsel %vm1064_vm2, %v789_v13, 0  ;;  %v1161_v18 = vsel %vm1064_vm2, %v790_v17, 0 }
  0xbe   : > { %1075 = vmatpush.bf16.msrb.mxu0 %v1066_v16  ;;  %1094 = vmatpush.bf16.msrb.mxu1 %v1085_v20 }
  0xc1   : > { %v760_v63 = vpop.f32.mrf.mxu2  ;;  %v785_v3 = vpop.f32.mrf.mxu3 }
  0xc2   : > { %v712_v0 = vpop.f32.mrf.mxu0  ;;  %v737_v1 = vpop.f32.mrf.mxu1  ;;  %v791_v2 = vpack.c.bf16 %v760_v63, %v760_v63  ;;  %v792_v8 = vpack.c.bf16 %v785_v3, %v785_v3 }
  0xc4   : > { %v1180_v4 = vsel %vm1064_vm2, %v791_v2, 0  ;;  %v1199_v10 = vsel %vm1064_vm2, %v792_v8, 0 }
  0xc5   : > { %1113 = vmatpush.bf16.msrb.mxu2 %v1104_v7  ;;  %1132 = vmatpush.bf16.msrb.mxu3 %v1123_v12 }
  0xc7   : > { %1615 = vmatmul.msk.bf16.vlgmr.msra.gmra.mxu0 %vm793_vm1, %v549_v47  ;;  %1616 = vmatmul.msk.bf16.vlgmr.msra.gmra.mxu1 %vm793_vm1, %v550_v48 }
  0xc8   : > { %1151 = vmatpush.bf16.msra.mxu0 %v1142_v14  ;;  %1170 = vmatpush.bf16.msra.mxu1 %v1161_v18 }
  0xc9   : > { %v762_v5 = vpop.f32.mrf.mxu2  ;;  %v787_v9 = vpop.f32.mrf.mxu3 }
  0xcc   : > { %1617 = vmatmul.msk.bf16.vlgmr.msra.gmra.mxu2 %vm793_vm1, %v551_v59  ;;  %1618 = vmatmul.msk.bf16.vlgmr.msra.gmra.mxu3 %vm793_vm1, %v552_v60 }
  0xcd   : > { %1189 = vmatpush.bf16.msra.mxu2 %v1180_v4  ;;  %1208 = vmatpush.bf16.msra.mxu3 %v1199_v10 }
 0x134   : > { %v809_v24 = vpop.f32.mrf.mxu0  ;;  %v828_v25 = vpop.f32.mrf.mxu1 }
 0x135   : > { %v870_v26 = vmul.f32 0.35355338, %v809_v24  ;;  %v871_v27 = vmul.f32 0.35355338, %v828_v25 }
 0x137   : > { %v2051_v28 = vsel %vm950_vm3, %v870_v26, -1e+30  ;;  %v2056_v30 = vsel %vm950_vm3, %v871_v27, -1e+30 }
 0x138   : > { %v957_v29 = vsel %vm793_vm1, %v2051_v28, -inf  ;;  %v960_v33 = vsel %vm793_vm1, %v2056_v30, -inf }
 0x139   : > { %958 = vmax.xlane.f32.xlu2 %v957_v29 }
 0x13c   : > { %v811_v31 = vpop.f32.mrf.mxu0  ;;  %v830_v32 = vpop.f32.mrf.mxu1 }
 0x13f   : > { %v847_v34 = vpop.f32.mrf.mxu2  ;;  %v866_v35 = vpop.f32.mrf.mxu3 }
 0x140   : > { %v872_v36 = vmul.f32 0.35355338, %v847_v34  ;;  %v873_v41 = vmul.f32 0.35355338, %v866_v35 }
 0x141   : > { %961 = vmax.xlane.f32.xlu2 %v960_v33 }
 0x142   : > { %v955_v37 = vsel %vm950_vm3, %v872_v36, -1e+30  ;;  %v956_v44 = vsel %vm950_vm3, %v873_v41, -1e+30 }
 0x143   : > { %v963_v40 = vsel %vm793_vm1, %v955_v37, -inf  ;;  %v966_v47 = vsel %vm793_vm1, %v956_v44, -inf }
 0x144   : > { %v890_v38 = vpop.f32.mrf.mxu0  ;;  %v906_v39 = vpop.f32.mrf.mxu1  ;;  %964 = vmax.xlane.f32.xlu0 %v963_v40 }
 0x145   : > { %v942_v48 = vmul.f32 0.35355338, %v890_v38  ;;  %v943_v58 = vmul.f32 0.35355338, %v906_v39 }
 0x147   : > { %v849_v42 = vpop.f32.mrf.mxu2  ;;  %v868_v43 = vpop.f32.mrf.mxu3  ;;  %v969_v53 = vsel %vm793_vm1, %v942_v48, -inf  ;;  %v972_v59 = vsel %vm793_vm1, %v943_v58, -inf }
 0x14c   : > { %v892_v45 = vpop.f32.mrf.mxu0  ;;  %v908_v46 = vpop.f32.mrf.mxu1  ;;  %967 = vmax.xlane.f32.xlu0 %v966_v47 }
 0x14f   : > { %v922_v49 = vpop.f32.mrf.mxu2  ;;  %v938_v50 = vpop.f32.mrf.mxu3 }
 0x150   : > { %v944_v51 = vmul.f32 0.35355338, %v922_v49  ;;  %v945_v54 = vmul.f32 0.35355338, %v938_v50 }
 0x152   : > { %v975_v52 = vsel %vm793_vm1, %v944_v51, -inf  ;;  %v978_v57 = vsel %vm793_vm1, %v945_v54, -inf }
 0x153   : > { %976 = vmax.xlane.f32.xlu1 %v975_v52 }
 0x154   : > { %970 = vmax.xlane.f32.xlu0 %v969_v53 }
 0x157   : > { %v924_v55 = vpop.f32.mrf.mxu2  ;;  %v940_v56 = vpop.f32.mrf.mxu3 }
 0x15b   : > { %979 = vmax.xlane.f32.xlu1 %v978_v57 }
 0x163   : > { %973 = vmax.xlane.f32.xlu1 %v972_v59 }
 0x1ac   : > { %v959_v4 = vpop.xlane.xlu2 %958 }
 0x1b4   : > { %v962_v19 = vpop.xlane.xlu2 %961 }
 0x1b7   : > { %v965_v60 = vpop.xlane.xlu0 %964 }
 0x1bf   : > { %v968_v61 = vpop.xlane.xlu0 %967 }
 0x1c6   : > { %v977_v62 = vpop.xlane.xlu1 %976 }
 0x1c7   : > { %v983_v63 = vmax.f32 %v965_v60, %v977_v62  ;;  %v971_v5 = vpop.xlane.xlu0 %970 }
 0x1c8   : > { %v981_v7 = vmax.f32 %v959_v4, %v971_v5 }
 0x1c9   : > { %v987_v0 = vsub.f32 %v955_v37, %v983_v63  ;;  %v999_v1 = vsub.f32 %v944_v51, %v983_v63 }
 0x1ca   : > { %v985_v12 = vsub.f32 %v2051_v28, %v981_v7  ;;  %v997_v16 = vsub.f32 %v942_v48, %v981_v7 }
 0x1cb   : > { %v993_v2 = vmul.f32 1.442695, %v987_v0  ;;  %v1005_v3 = vmul.f32 1.442695, %v999_v1 }
 0x1cc   : > { %v989_v21 = vmul.f32 1.442695, %v985_v12  ;;  %v1001_v23 = vmul.f32 1.442695, %v997_v16  ;;  %v1218_v12 = vld [vmem:[%s2156_s4] sm:$0xf] }
 0x1cd   : > { %1714 = vpow2.f32 %v993_v2 }
 0x1ce   : > { %1716 = vpow2.f32 %v1005_v3  ;;  %v980_v6 = vpop.xlane.xlu1 %979 }
 0x1cf   : > { %v984_v8 = vmax.f32 %v968_v61, %v980_v6 }
 0x1d1   : > { %v988_v9 = vsub.f32 %v956_v44, %v984_v8  ;;  %v1000_v10 = vsub.f32 %v945_v54, %v984_v8  ;;  %v1220_v8 = vld [vmem:[%s2156_s4 + $0x8] sm:$0xf] }
 0x1d3   : > { %v2068_v11 = vpop.eup %1714  ;;  %v995_v13 = vmul.f32 1.442695, %v988_v9  ;;  %v1007_v14 = vmul.f32 1.442695, %v1000_v10  ;;  %v1264_v9 = vsel %vm1064_vm2, %v1220_v8, 0 }
 0x1d4   : > { %v1717_v15 = vpop.eup %1716  ;;  %v1015_v17 = vsel %vm793_vm1, %v2068_v11, 0.0  ;;  %v1221_v10 = vld [vmem:[%s2156_s4 + $0xc] sm:$0xf] }
 0x1d5   : > { %1718 = vpow2.f32 %v995_v13  ;;  %v1027_v18 = vsel %vm793_vm1, %v1717_v15, 0.0  ;;  %1016 = vadd.xlane.f32.xlu2 %v1015_v17  ;;  %v1226_v13 = vsel %vm1064_vm2, %v1218_v12, 0 }
 0x1d6   : > { %1720 = vpow2.f32 %v1007_v14  ;;  %1028 = vadd.xlane.f32.xlu1 %v1027_v18  ;;  %v974_v20 = vpop.xlane.xlu1 %973 }
 0x1d7   : > { %v982_v22 = vmax.f32 %v962_v19, %v974_v20  ;;  %1722 = vpow2.f32 %v989_v21 }
 0x1d8   : > { %1724 = vpow2.f32 %v1001_v23 }
 0x1d9   : > { %v986_v24 = vsub.f32 %v2056_v30, %v982_v22  ;;  %v998_v27 = vsub.f32 %v943_v58, %v982_v22 }
 0x1db   : > { %v1719_v25 = vpop.eup %1718  ;;  %v991_v26 = vmul.f32 1.442695, %v986_v24  ;;  %v1003_v32 = vmul.f32 1.442695, %v998_v27 }
 0x1dc   : > { %v1721_v28 = vpop.eup %1720  ;;  %v1018_v29 = vsel %vm793_vm1, %v1719_v25, 0.0 }
 0x1dd   : > { %1726 = vpow2.f32 %v991_v26  ;;  %v1030_v31 = vsel %vm793_vm1, %v1721_v28, 0.0  ;;  %1019 = vadd.xlane.f32.xlu0 %v1018_v29  ;;  %v1723_v33 = vpop.eup %1722 }
 0x1de   : > { %1031 = vadd.xlane.f32.xlu2 %v1030_v31  ;;  %v1725_v34 = vpop.eup %1724  ;;  %1728 = vpow2.f32 %v1003_v32  ;;  %v1009_v36 = vsel %vm793_vm1, %v1723_v33, 0.0 }
 0x1df   : > { %v1021_v37 = vsel %vm793_vm1, %v1725_v34, 0.0 }
 0x1e3   : > { %v1727_v35 = vpop.eup %1726 }
 0x1e4   : > { %v1012_v30 = vsel %vm793_vm1, %v1727_v35, 0.0  ;;  %v1729_v38 = vpop.eup %1728 }
 0x1e5   : > { %1013 = vadd.xlane.f32.xlu1 %v1012_v30  ;;  %1010 = vadd.xlane.f32.xlu0 %v1009_v36  ;;  %v1024_v39 = vsel %vm793_vm1, %v1729_v38, 0.0 }
 0x1e6   : > { %1022 = vadd.xlane.f32.xlu2 %v1021_v37 }
 0x1ed   : > { %1025 = vadd.xlane.f32.xlu0 %v1024_v39 }
 0x248   : > { %v1017_v40 = vpop.xlane.xlu2 %1016 }
 0x249   : > { %v1029_v41 = vpop.xlane.xlu1 %1028 }
 0x24a   : > { %v1035_v42 = vadd.f32 %v1029_v41, %v1017_v40 }
 0x24c   : > { %1730 = vrcp.f32 %v1035_v42 }
 0x250   : > { %v1020_v43 = vpop.xlane.xlu0 %1019 }
 0x251   : > { %v1032_v44 = vpop.xlane.xlu2 %1031 }
 0x252   : > { %v1731_v45 = vpop.eup %1730  ;;  %v1036_v46 = vadd.f32 %v1032_v44, %v1020_v43 }
 0x253   : > { %v1051_v47 = vmul.f32 %v1731_v45, %v1717_v15  ;;  %v1043_v57 = vmul.f32 %v1731_v45, %v2068_v11  ;;  %v1283_v11 = vsel %vm1064_vm2, %v1221_v10, 0  ;;  %v1219_v15 = vld [vmem:[%s2156_s4 + $0x4] sm:$0xf] }
 0x254   : > { %1732 = vrcp.f32 %v1036_v46  ;;  %v1245_v16 = vsel %vm1064_vm2, %v1219_v15, 0 }
 0x255   : > { %v1055_v48 = vpack.c.bf16 %v1051_v47, %v1051_v47  ;;  %v1047_v61 = vpack.c.bf16 %v1043_v57, %v1043_v57 }
 0x257   : > { %1621 = vmatmul.msk.bf16.vlgmr.msrb.gmra.mxu2 %vm793_vm1, %v1055_v48 }
 0x258   : > { %v1011_v49 = vpop.xlane.xlu0 %1010  ;;  %v1014_v55 = vpop.xlane.xlu1 %1013  ;;  %1273 = vmatpush.bf16.msrb.mxu2 %v1264_v9 }
 0x259   : > { %v1023_v50 = vpop.xlane.xlu2 %1022 }
 0x25a   : > { %v1733_v51 = vpop.eup %1732  ;;  %v1033_v52 = vadd.f32 %v1023_v50, %v1011_v49 }
 0x25b   : > { %v1052_v53 = vmul.f32 %v1733_v51, %v1721_v28  ;;  %v1044_v0 = vmul.f32 %v1733_v51, %v1719_v25 }
 0x25c   : > { %1734 = vrcp.f32 %v1033_v52 }
 0x25d   : > { %v1056_v54 = vpack.c.bf16 %v1052_v53, %v1052_v53  ;;  %v1048_v3 = vpack.c.bf16 %v1044_v0, %v1044_v0 }
 0x25f   : > { %1622 = vmatmul.msk.bf16.vlgmr.msrb.gmra.mxu3 %vm793_vm1, %v1056_v54 }
 0x260   : > { %v1026_v56 = vpop.xlane.xlu0 %1025  ;;  %1292 = vmatpush.bf16.msrb.mxu3 %v1283_v11 }
 0x261   : > { %v1034_v58 = vadd.f32 %v1026_v56, %v1014_v55 }
 0x262   : > { %v1735_v59 = vpop.eup %1734 }
 0x263   : > { %v1049_v60 = vmul.f32 %v1735_v59, %v1725_v34  ;;  %1736 = vrcp.f32 %v1034_v58  ;;  %v1041_v4 = vmul.f32 %v1735_v59, %v1723_v33 }
 0x265   : > { %v1053_v62 = vpack.c.bf16 %v1049_v60, %v1049_v60  ;;  %v1045_v5 = vpack.c.bf16 %v1041_v4, %v1041_v4 }
 0x267   : > { %1619 = vmatmul.msk.bf16.vlgmr.msrb.gmra.mxu0 %vm793_vm1, %v1053_v62  ;;  %1625 = vmatmul.msk.bf16.vlgmr.msra.gmra.mxu2 %vm793_vm1, %v1047_v61 }
 0x268   : > { %1235 = vmatpush.bf16.msrb.mxu0 %v1226_v13 }
 0x269   : > { %v1737_v63 = vpop.eup %1736 }
 0x26a   : > { %v1050_v1 = vmul.f32 %v1737_v63, %v1729_v38  ;;  %v1042_v6 = vmul.f32 %v1737_v63, %v1727_v35 }
 0x26c   : > { %v1054_v2 = vpack.c.bf16 %v1050_v1, %v1050_v1  ;;  %v1046_v7 = vpack.c.bf16 %v1042_v6, %v1042_v6 }
 0x26e   : > { %1620 = vmatmul.msk.bf16.vlgmr.msrb.gmra.mxu1 %vm793_vm1, %v1054_v2 }
 0x26f   : > { %1626 = vmatmul.msk.bf16.vlgmr.msra.gmra.mxu3 %vm793_vm1, %v1048_v3  ;;  %1254 = vmatpush.bf16.msrb.mxu1 %v1245_v16 }
 0x277   : > { %1623 = vmatmul.msk.bf16.vlgmr.msra.gmra.mxu0 %vm793_vm1, %v1045_v5 }
 0x27e   : > { %1624 = vmatmul.msk.bf16.vlgmr.msra.gmra.mxu1 %vm793_vm1, %v1046_v7 }
 0x2da   : > { %v1115_v14 = vpop.f32.mrf.mxu2 }
 0x2e2   : > { %v1117_v17 = vpop.f32.mrf.mxu2  ;;  %v1134_v18 = vpop.f32.mrf.mxu3 }
 0x2e4   : > { %v1077_v19 = vpop.f32.mrf.mxu0 }
 0x2ea   : > { %v1136_v20 = vpop.f32.mrf.mxu3  ;;  %v1191_v21 = vpop.f32.mrf.mxu2 }
 0x2eb   : > { %v1192_v22 = vadd.f32 %v1191_v21, %v1115_v14  ;;  %v1096_v23 = vpop.f32.mrf.mxu1 }
 0x2ec   : > { %v1079_v24 = vpop.f32.mrf.mxu0 }
 0x2ed   : > { %v1216_v25 = vpack.c.bf16 %v1192_v22, %v1192_v22 }
 0x2ef   : > { %1629 = vmatmul.msk.bf16.vlgmr.msrb.gmra.mxu2 %vm793_vm1, %v1216_v25 }
 0x2f2   : > { %v1193_v26 = vpop.f32.mrf.mxu2  ;;  %v1210_v27 = vpop.f32.mrf.mxu3 }
 0x2f3   : > { %v1211_v28 = vadd.f32 %v1210_v27, %v1134_v18  ;;  %v1098_v29 = vpop.f32.mrf.mxu1 }
 0x2f4   : > { %v1153_v31 = vpop.f32.mrf.mxu0 }
 0x2f5   : > { %v1217_v32 = vpack.c.bf16 %v1211_v28, %v1211_v28  ;;  %v1154_v33 = vadd.f32 %v1153_v31, %v1077_v19 }
 0x2f7   : > { %v1214_v34 = vpack.c.bf16 %v1154_v33, %v1154_v33  ;;  %1630 = vmatmul.msk.bf16.vlgmr.msrb.gmra.mxu3 %vm793_vm1, %v1217_v32 }
 0x2f9   : > { %1627 = vmatmul.msk.bf16.vlgmr.msrb.gmra.mxu0 %vm793_vm1, %v1214_v34 }
 0x2fa   : > { %v1212_v35 = vpop.f32.mrf.mxu3 }
 0x2fb   : > { %v1172_v30 = vpop.f32.mrf.mxu1 }
 0x2fc   : > { %v1155_v36 = vpop.f32.mrf.mxu0  ;;  %v1173_v37 = vadd.f32 %v1172_v30, %v1096_v23 }
 0x2fe   : > { %v1215_v38 = vpack.c.bf16 %v1173_v37, %v1173_v37 }
 0x300   : > { %1628 = vmatmul.msk.bf16.vlgmr.msrb.gmra.mxu1 %vm793_vm1, %v1215_v38 }
 0x303   : > { %v1174_v39 = vpop.f32.mrf.mxu1 }
 0x372   : > { %v1275_v40 = vpop.f32.mrf.mxu2 }
 0x373   : > { %v1301_v49 = vsel %vm457_vm0, %v1275_v40, 0.0 }
 0x376   : > { %v1237_v41 = vpop.f32.mrf.mxu0 }
 0x377   : > { %v1298_v45 = vsel %vm457_vm0, %v1237_v41, 0.0 }
 0x37a   : > { %v1277_v42 = vpop.f32.mrf.mxu2  ;;  %v1294_v43 = vpop.f32.mrf.mxu3 }
 0x37b   : > { %v1303_v51 = vsel %vm457_vm0, %v1294_v43, 0.0 }
 0x37d   : > { %v1256_v44 = vpop.f32.mrf.mxu1 }
 0x37e   : > { %v1239_v46 = vpop.f32.mrf.mxu0  ;;  %v1299_v47 = vsel %vm457_vm0, %v1256_v44, 0.0 }
 0x37f   : > { %v1300_v48 = vadd.f32 %v1299_v47, %v1298_v45 }
 0x381   : > { %v1302_v50 = vadd.f32 %v1301_v49, %v1300_v48 }
 0x382   : > { %v1296_v52 = vpop.f32.mrf.mxu3 }
 0x383   : > { %v1304_v53 = vadd.f32 %v1303_v51, %v1302_v50 }
 0x385   : > { %v1258_v54 = vpop.f32.mrf.mxu1  ;;  %1309 = vst.msk [vmem:[%s383_s19] sm:$0xff] %vm457_vm0, %v1304_v53 }
 0x386   : > { %1765 = shalt.err (!%p1762_p5)
}
 0x387   : > { %1659 = dma.vmem_to_hbm [thread:$0]  (%p1898_p4), %s1331_s21, 128, %s1333_s22, %s1318_s27  }
 0x388 PF: > { %p1665_p6 = scmp.ge.s32.totalorder %s1816_s29, 2  ;;  %s1344_s15 = sand.u32 1, %s1796_s24  }
 0x389   : > { %s1345_s18 = scalar_lea.sflag [#allocation3], %s1344_s15 }
 0x38a   : > { %p1662_p7 = pnand %p1665_p6, %p1905_p8 }
 0x38c   : > { %p1663_p9 = pneg %p1662_p7 }
 0x38e   : > { %1791 = dma.done.wait (%p1663_p9), %s1345_s18, 128  }
 0x38f   : > { %1793 = vsyncadd (%p1663_p9), %s1345_s18, 4294967168  ;;  %s20_s29 = sadd.s32 1, %s1816_s29   ;;  %s2162_s24 = smov %s1800_s25 }
 0x390   : > { %p17_p10 = scmp.ge.s32.totalorder %s20_s29, 4   ;;  %s2163_s25 = smov %s1804_s26 }
 0x391   : > { %s2164_s26 = smov %s1911_s14  ;;  %s2165_s27 = smov %s1812_s28 }
 0x392   : > { %s2166_s28 = smov %s2168_s9  ;;  %19 = sbr.rel (!%p17_p10) target bundleno = 4 (0x4), region = 109 }
 0x397   :  { %1351 = vsyncpa [#allocation3], 1 }
 0x398   :  { %1353 = vsyncpa [#allocation3 + $0x1], 1 }

</bundles_post_ra>
